<compile_context>
chip_gen: v7x
topology: tpu7x:2x2x1
jax: 0.10.0
libtpu: 0.0.40
codegen_flags: <defaults>
</compile_context>

<pallas_src>
from functools import partial

import jax
import jax.numpy as jnp
from jax.experimental import pallas as pl
from jax.experimental.pallas import tpu as pltpu


def _gem_kernel(x_ref, o_ref, acc_ref, *, p, p_int, eps, L, TL, needs_mask):
    """Grid = (row_tiles, L_tiles); the L (reduction) axis is innermost."""
    k = pl.program_id(1)

    # Init the f32 running-sum accumulator at the start of each row tile.
    @pl.when(k == 0)
    def _():
        acc_ref[...] = jnp.zeros_like(acc_ref)

    # Per-chunk upcast + clamp: f32 temporaries stay one (TR, TL) tile.
    x = jnp.maximum(x_ref[...].astype(jnp.float32), eps)        # (TR, TL)

    # Integer-p fast path: VALU multiplies instead of EUP exp/log.
    if p_int is not None:
        xp = x
        for _ in range(p_int - 1):
            xp = xp * x
    else:
        xp = jnp.power(x, p)

    # Lane-dense partial row sums via a ones/mask matmul on the (idle) MXU:
    #   acc[i, r] += sum_l lhs[i, l] * xp[r, l]
    # The mask zeroes padded L columns exactly.
    if needs_mask:
        col = k * TL + jax.lax.broadcasted_iota(jnp.int32, (8, TL), 1)
        lhs = (col < L).astype(jnp.float32)
    else:
        lhs = jnp.ones((8, TL), dtype=jnp.float32)
    acc_ref[...] += jax.lax.dot_general(
        lhs, xp, (((1,), (1,)), ((), ())),
        preferred_element_type=jnp.float32)                      # (8, TR)

    # Finalize: single 1/L multiply + pow(1/p) on TR values, lane-dense store.
    @pl.when(k == pl.num_programs(1) - 1)
    def _():
        m = acc_ref[0:1, :] * (1.0 / L)                          # (1, TR)
        y = m if p == 1.0 else jnp.power(m, 1.0 / p)
        o_ref[...] = y.astype(o_ref.dtype)[None]                 # (1, 1, TR)


def _choose_tile(extent, target, unit):
    """Tile size (multiple of `unit`, ~<= target) and padded extent / n_tiles."""
    if extent <= target:
        return extent, extent, 1
    n_tiles = -(-extent // target)                 # ceil divide
    tile = unit * (-(-extent // (unit * n_tiles)))  # round tile up to `unit`
    return tile, tile * n_tiles, n_tiles


def generalized_mean_pooling(x, norm=3.0, output_size=1, eps=1e-6,
                             tr_max=256, tl_max=2048):
    """GeM pooling over the last axis: (B, C, L) -> (B, C, 1)."""
    p = float(norm)
    assert p > 0
    # TODO(synk): adaptive_avg_pool1d with output_size > 1 (segmented means)
    # not implemented; the module default output_size=1 is supported.
    assert output_size == 1, "only output_size=1 implemented"

    B, C, L = x.shape
    rows = B * C
    x2 = x.reshape(rows, L)

    # (B*C, L) -> (TR, TL) tiles; pad only when tiling requires it.
    TR, rows_p, n_r = _choose_tile(rows, tr_max, 8)
    TL, L_p, n_l = _choose_tile(L, tl_max, 128)
    needs_mask = L_p != L
    if rows_p != rows or L_p != L:
        # Padded rows are sliced off; padded L columns are masked in-kernel.
        x2 = jnp.pad(x2, ((0, rows_p - rows), (0, L_p - L)),
                     constant_values=1.0)

    p_int = int(p) if p.is_integer() and 1.0 <= p <= 8.0 else None

    out = pl.pallas_call(
        partial(_gem_kernel, p=p, p_int=p_int, eps=float(eps), L=L, TL=TL,
                needs_mask=needs_mask),
        out_shape=jax.ShapeDtypeStruct((n_r, 1, TR), x.dtype),
        grid=(n_r, n_l),
        in_specs=[pl.BlockSpec((TR, TL), lambda i, k: (i, k))],
        out_specs=pl.BlockSpec((1, 1, TR), lambda i, k: (i, 0, 0)),
        scratch_shapes=[pltpu.VMEM((8, TR), jnp.float32)],
        compiler_params=pltpu.CompilerParams(
            dimension_semantics=("parallel", "arbitrary"),
            vmem_limit_bytes=32 * 1024 * 1024,
        ),
    )(x2)

    return out.reshape(rows_p)[:rows].reshape(B, C, 1)


def _reference(x, norm=3.0, eps=1e-6):
    xp = jnp.power(jnp.maximum(x, eps), norm)
    return jnp.power(jnp.mean(xp, axis=-1, keepdims=True), 1.0 / norm)


if __name__ == "__main__":
    p, eps = 3.0, 1e-6

    # Small shape matching the module's (B, C, L) layout.
    B, C, L = 2, 4, 16
    x = jax.random.normal(jax.random.PRNGKey(0), (B, C, L), dtype=jnp.float32)
    out = jax.block_until_ready(generalized_mean_pooling(x, norm=p, eps=eps))
    ref = _reference(x, norm=p, eps=eps)
    assert out.shape == (B, C, 1), out.shape
    assert jnp.allclose(out, ref, atol=1e-5, rtol=1e-5), (
        f"mismatch: max abs err {float(jnp.max(jnp.abs(out - ref)))}")

    # Exercise the tiled / padded / masked reduction path with tiny tile caps.
    B2, C2, L2 = 2, 17, 300
    x2 = jax.random.normal(jax.random.PRNGKey(0), (B2, C2, L2),
                           dtype=jnp.float32)
    out2 = jax.block_until_ready(
        generalized_mean_pooling(x2, norm=p, eps=eps, tr_max=8, tl_max=128))
    ref2 = _reference(x2, norm=p, eps=eps)
    assert out2.shape == (B2, C2, 1), out2.shape
    assert jnp.allclose(out2, ref2, atol=1e-5, rtol=1e-5), (
        f"mismatch (tiled path): max abs err "
        f"{float(jnp.max(jnp.abs(out2 - ref2)))}")

    print("KERNEL_OK")
</pallas_src>

<mosaic_0001>
module attributes {stable_mosaic.version = 11 : i64} {
  func.func @_gem_kernel(%arg0: i32, %arg1: i32, %arg2: memref<8x16xf32, #tpu.memory_space<vmem>>, %arg3: memref<1x1x8xf32, #tpu.memory_space<vmem>>, %arg4: memref<8x8xf32, #tpu.memory_space<vmem>>) attributes {dimension_semantics = [#tpu.dimension_semantics<parallel>, #tpu.dimension_semantics<arbitrary>], iteration_bounds = array<i64: 1, 1>, scalar_prefetch = 0 : i64, scratch_operands = 1 : i64, tpu.core_type = #tpu.core_type<tc>, window_params = [{transform_indices = @transform_0, window_bounds = array<i64: 8, 16>}, {transform_indices = @transform_1, window_bounds = array<i64: 1, 1, 8>}]} {
    %c0_i32 = arith.constant 0 : i32
    %0 = arith.cmpi eq, %arg1, %c0_i32 : i32
    %1 = arith.extui %0 : i1 to i32
    %c0_i32_0 = arith.constant 0 : i32
    %2 = arith.cmpi ne, %1, %c0_i32_0 : i32
    scf.if %2 {
      %cst_10 = arith.constant 0.000000e+00 : f32
      %16 = vector.broadcast %cst_10 : f32 to vector<8x8xf32>
      %c0_11 = arith.constant 0 : index
      %c0_12 = arith.constant 0 : index
      %17 = vector.load %arg4[%c0_11, %c0_12] : memref<8x8xf32, #tpu.memory_space<vmem>>, vector<8x8xf32>
      tpu.vector_store %arg4[%c0_11, %c0_12], %16 {strides = array<i32>} : memref<8x8xf32, #tpu.memory_space<vmem>>, vector<8x8xf32>,
    } else {
    }
    %c0 = arith.constant 0 : index
    %c0_1 = arith.constant 0 : index
    %3 = vector.load %arg2[%c0, %c0_1] : memref<8x16xf32, #tpu.memory_space<vmem>>, vector<8x16xf32>
    %cst = arith.constant 9.99999997E-7 : f32
    %4 = vector.broadcast %cst : f32 to vector<8x16xf32>
    %5 = arith.maximumf %3, %4 : vector<8x16xf32>
    %6 = arith.mulf %5, %5 : vector<8x16xf32>
    %7 = arith.mulf %6, %5 : vector<8x16xf32>
    %cst_2 = arith.constant 1.000000e+00 : f32
    %8 = vector.broadcast %cst_2 : f32 to vector<8x16xf32>
    %c0_3 = arith.constant 0 : index
    %c0_4 = arith.constant 0 : index
    %9 = vector.load %arg4[%c0_3, %c0_4] : memref<8x8xf32, #tpu.memory_space<vmem>>, vector<8x8xf32>
    %cst_5 = arith.constant dense<0.000000e+00> : vector<8x8xf32>
    %10 = tpu.matmul %8, %7, %cst_5 {dimension_numbers = #tpu.dot_dimension_numbers<[1], [1], [0], [0], [0, 0, 1, 0], [], []>} : vector<8x16xf32>, vector<8x16xf32>, vector<8x8xf32> -> vector<8x8xf32>
    %11 = arith.addf %9, %10 : vector<8x8xf32>
    %c0_6 = arith.constant 0 : index
    %c0_7 = arith.constant 0 : index
    %12 = vector.load %arg4[%c0_6, %c0_7] : memref<8x8xf32, #tpu.memory_space<vmem>>, vector<8x8xf32>
    tpu.vector_store %arg4[%c0_6, %c0_7], %11 {strides = array<i32>} : memref<8x8xf32, #tpu.memory_space<vmem>>, vector<8x8xf32>,
    %c0_i32_8 = arith.constant 0 : i32
    %13 = arith.cmpi eq, %arg1, %c0_i32_8 : i32
    %14 = arith.extui %13 : i1 to i32
    %c0_i32_9 = arith.constant 0 : i32
    %15 = arith.cmpi ne, %14, %c0_i32_9 : i32
    scf.if %15 {
      %c0_10 = arith.constant 0 : index
      %c0_11 = arith.constant 0 : index
      %16 = vector.load %arg4[%c0_10, %c0_11] : memref<8x8xf32, #tpu.memory_space<vmem>>, vector<1x8xf32>
      %cst_12 = arith.constant 6.250000e-02 : f32
      %17 = vector.broadcast %cst_12 : f32 to vector<1x8xf32>
      %18 = arith.mulf %16, %17 : vector<1x8xf32>
      %cst_13 = arith.constant 0.333333343 : f32
      %19 = vector.broadcast %cst_13 : f32 to vector<1x8xf32>
      %20 = math.powf %18, %19 : vector<1x8xf32>
      %21 = vector.shape_cast %20 : vector<1x8xf32> to vector<1x1x8xf32>
      %c0_14 = arith.constant 0 : index
      %c0_15 = arith.constant 0 : index
      %c0_16 = arith.constant 0 : index
      %22 = vector.load %arg3[%c0_14, %c0_15, %c0_16] : memref<1x1x8xf32, #tpu.memory_space<vmem>>, vector<1x1x8xf32>
      tpu.vector_store %arg3[%c0_14, %c0_15, %c0_16], %21 {strides = array<i32>} : memref<1x1x8xf32, #tpu.memory_space<vmem>>, vector<1x1x8xf32>,
    } else {
    }
    return
  }
  func.func @transform_0(%arg0: i32, %arg1: i32) -> (i32, i32) {
    %c0_i32 = arith.constant 0 : i32
    return %arg0, %arg1 : i32, i32
  }
  func.func @transform_1(%arg0: i32, %arg1: i32) -> (i32, i32, i32) {
    %c0_i32 = arith.constant 0 : i32
    %c0_i32_0 = arith.constant 0 : i32
    %c0_i32_1 = arith.constant 0 : i32
    return %arg0, %c0_i32, %c0_i32_0 : i32, i32, i32
  }
}

</mosaic_0001>

<bundles_post_ra>
// kernel: tpu_custom_call.1
= control target key start
LH: loop header
LB: loop body
LE: loop exit
PB: predicated region body
PF: predicated region fallthrough
CT: control target
= control target key end

     0   :  { %6 = vsyncpa [#allocation4], 0  ;;  %s260_s0 = inlined_call_operand.hbm [shape: f32[8,16], index: 0, kind: input, shape index: {}]   ;;  %s261_s1 = inlined_call_operand.hbm [shape: f32[1,1,8], index: 1, kind: output, shape index: {}]  }
   0x1   :  { %7 = vsyncpa [#allocation5], 0  ;;  %s219_s6 = smov [#allocation3]   ;;  %s171_s10 = scalar_lea.hbm %s260_s0, 128 }
   0x2   :  { %s14_s7 = sshll.u32 %s219_s6, 4  ;;  %p172_p0 = scmp.ne.s32.totalorder %s260_s0, %s171_s10  ;;  %s15_s7 = int_to_ptr.vmem [resolvable:$true] %s14_s7 }
   0x3   :  { %p175_p1 = scmp.lt.u32.totalorder %s171_s10, %s260_s0 }
   0x5   :  { %p177_p2 = pnand %p175_p1, %p172_p0 }
   0x7   :  { %180 = shalt.err (!%p177_p2)
}
   0x8   :  { %s181_s15 = scalar_lea.vmem %s15_s7, 128  ;;  %p186_p4 = scmp.lt.s32.totalorder %s15_s7, %s15_s7 }
   0x9   :  { %p182_p3 = scmp.ne.s32.totalorder %s15_s7, %s181_s15  ;;  %p187_p5 = scmp.lt.s32.totalorder %s181_s15, %s181_s15 }
   0xb   :  { %p188_p6 = por %p187_p5, %p186_p4 }
   0xd   :  { %p189_p7 = pnand %p188_p6, %p182_p3 }
   0xf   :  { %192 = shalt.err (!%p189_p7)
}
  0x10   :  { %17 = dma.hbm_to_vmem [thread:$0]  %s260_s0, 128, %s15_s7, [#allocation4]  }
  0x11   :  { %215 = dma.done.wait [#allocation4], 128  }
  0x12   :  { %216 = vsyncadd [#allocation4], 4294967168  ;;  %vm25_vm0 = vcmask 64512   ;;  %v220_v0 = vmov 0.0   ;;  %vm221_vm1 = vmmov 0   ;;  %v27_v1 = vld [vmem:[#allocation3] sm:$0xff] }
  0x13   :  { %26 = vst.msk [vmem:[#allocation2] sm:$0xff] %vm25_vm0, %v220_v0  ;;  %139 = vmatprep.subr.mxu0 %v220_v0  ;;  %141 = vmatprep.mubr.msk.f32.mxu0 %vm221_vm1, %v220_v0  ;;  %v28_v2 = vmax.f32 %v27_v1, 1e-06  ;;  %vm32_vm2 = vcmask 130048   ;;  %v222_v5 = vmov 1.0   ;;  %s223_s0 = smov [#allocation6]  }
  0x14   :  { %s126_s18 = sshll.u32 %s223_s0, 4  ;;  %vm118_vm7 = vcmask 57344   ;;  %s127_s18 = int_to_ptr.vmem [resolvable:$true] %s126_s18 }
  0x15   :  { %v29_v3 = vmul.f32 %v28_v2, %v28_v2  ;;  %s193_s19 = scalar_lea.vmem %s127_s18, 16  ;;  %s197_s20 = scalar_lea.vmem %s127_s18, 32 }
  0x16   :  { %p194_p8 = scmp.ne.s32.totalorder %s127_s18, %s193_s19  ;;  %p198_p9 = scmp.lt.s32.totalorder %s127_s18, %s127_s18 }
  0x17   :  { %v30_v4 = vmul.f32 %v29_v3, %v28_v2  ;;  %p199_p10 = scmp.lt.s32.totalorder %s197_s20, %s193_s19 }
  0x19   :  { %140 = vmatpush3.xpose.msk.msra.mxu0 %vm32_vm2, %v30_v4  ;;  %p200_p11 = por %p199_p10, %p198_p9 }
  0x1a   :  { %v31_v6 = vld [vmem:[#allocation2] sm:$0xff] }
  0x1b   :  { %p201_p12 = pnand %p200_p11, %p194_p8 }
  0x1c   :  { %142 = vmatmul.mubr.msk.f32.vlgmr.msra.gmra.mrb[0].mxu0 %vm32_vm2, %v222_v5 }
  0xef   :  { %v105_v7 = vpop.f32.mrb[0].mxu0 }
  0xf0   :  { %v109_v8 = vadd.f32 %v105_v7, %v31_v6  ;;  %v143_v9 = vpop.f32.mrb[1].mxu0 }
  0xf2   :  { %111 = vst.msk [vmem:[#allocation2] sm:$0xff] %vm25_vm0, %v109_v8 }
  0xf9   :  { %v115_v10 = vld [vmem:[#allocation2] sm:$0x1] }
  0xfa   :  { %v116_v11 = vmul.f32 0.0625, %v115_v10 }
  0xfc   :  { %v146_v12 = vand.u32 2147483647, %v116_v11  ;;  %v150_v15 = vand.u32 2147483648, %v116_v11  ;;  %vm145_vm5 = vcmp.lt.f32.partialorder %v116_v11, 0.0  ;;  %vm144_vm6 = vcmp.eq.f32.partialorder %v116_v11, 0.0 }
  0xfe   :  { %167 = vlog2.f32 %v146_v12  ;;  %vm154_vm3 = vweird.f32 %v146_v12  ;;  %vm156_vm4 = vcmp.eq.f32.partialorder %v146_v12, 0.0  ;;  %vm147_vm8 = vcmp.eq.f32.partialorder %v146_v12, inf }
 0x108   :  { %v168_v13 = vpop.eup %167 }
 0x109   :  { %v151_v14 = vmul.f32 0.33333334, %v168_v13 }
 0x10b   :  { %169 = vpow2.f32 %v151_v14 }
 0x115   :  { %v170_v16 = vpop.eup %169 }
 0x116   :  { %v153_v17 = vor.u32 %v170_v16, %v150_v15 }
 0x118   :  { %v155_v18 = vsel %vm154_vm3, %v116_v11, %v153_v17 }
 0x119   :  { %v158_v19 = vsel %vm156_vm4, %v150_v15, %v155_v18 }
 0x11a   :  { %v159_v20 = vsel %vm145_vm5, nan, %v158_v19 }
 0x11b   :  { %v160_v21 = vsel %vm144_vm6, 0.0, %v159_v20 }
 0x11c   :  { %v161_v22 = vsel %vm147_vm8, inf, %v160_v21 }
 0x11d   :  { %119 = vst.msk [vmem:[#allocation6] sm:$0x1] %vm118_vm7, %v161_v22 }
 0x11e   :  { %204 = shalt.err (!%p201_p12)
}
 0x11f   :  { %s205_s23 = scalar_lea.hbm %s261_s1, 16 }
 0x120   :  { %p206_p13 = scmp.ne.s32.totalorder %s261_s1, %s205_s23  ;;  %p209_p0 = scmp.lt.u32.totalorder %s205_s23, %s261_s1 }
 0x122   :  { %p211_p1 = pnand %p209_p0, %p206_p13 }
 0x124   :  { %214 = shalt.err (!%p211_p1)
}
 0x125   :  { %129 = dma.vmem_to_hbm [thread:$0]  %s127_s18, 16, %s261_s1, [#allocation5]  }
 0x126   :  { %217 = dma.done.wait [#allocation5], 16  }
 0x127   :  { %218 = vsyncadd [#allocation5], 4294967280 }
 0x128   :  { %133 = vsyncpa [#allocation4], 1 }
 0x129   :  { %134 = vsyncpa [#allocation5], 1 }

</bundles_post_ra>
